<compile_context>
chip_gen: v7x
topology: tpu7x:2x2x1
jax: 0.10.0
libtpu: 0.0.40
codegen_flags: <defaults>
</compile_context>

<pallas_src>
import math
import functools

import jax
import jax.numpy as jnp
from jax.experimental import pallas as pl
from jax.experimental.pallas import tpu as pltpu

_LANES = 128  # TPU vreg lane width; padded score / value / output block width.


def _round_up(x, m):
    return ((x + m - 1) // m) * m


# --------------------------------------------------------------------------- #
# Kernel
# --------------------------------------------------------------------------- #
def smart_attention_kernel(x_ref, w0_ref, b0_ref, w1_ref, b1_ref,
                           ssel_ref, tsel_ref, out_ref,
                           *, output_size: int, num_clients: int, krep_pad: int):
    O, C = output_size, num_clients
    f32 = jnp.float32
    cdt = w0_ref.dtype  # MXU input dtype (bf16 recommended on v5e/v6e/v7x)

    x = x_ref[...].astype(cdt)  # [layer_input || original_input]

    # Fused layer 0 (value | key | query hidden units side by side).
    h = jnp.maximum(
        jnp.dot(x, w0_ref[...], preferred_element_type=f32)
        + b0_ref[...].astype(f32), 0.0)

    # Fused layer 1, block-diagonal output:
    #   [ key replicated (krep_pad) | value (128) | query replicated (krep_pad) ]
    acts = (jnp.dot(h.astype(cdt), w1_ref[...], preferred_element_type=f32)
            + b1_ref[...].astype(f32))
    k_rep = acts[:, :krep_pad]                          # lane-tile aligned slices
    value = acts[:, krep_pad:krep_pad + _LANES]
    q_rep = acts[:, krep_pad + _LANES:]

    # scores[b, c*O+o] = scale * sum_j query[b,o,j] * key[b,c,j]
    prod = (q_rep * k_rep).astype(cdt)                                  # VPU
    scores = jnp.dot(prod, ssel_ref[...], preferred_element_type=f32)   # MXU (Bt,128)

    # Softmax over the client axis: group max via ceil(log2(C)) rolls (XLU).
    m = scores
    covered = 1
    while covered < C:
        shift = min(covered, C - covered)
        m = jnp.maximum(m, pltpu.roll(m, shift * O, axis=1))
        covered += shift
    e = jnp.exp(scores - m)                                             # EUP

    # Merged den/num reduction: one 256-wide matmul against block_diag(tsel,tsel).
    lhs = jnp.concatenate([e, e * value], axis=1).astype(cdt)           # (Bt, 256)
    dn = jnp.dot(lhs, tsel_ref[...], preferred_element_type=f32)        # (Bt, 256)
    den = dn[:, :_LANES] + 1e-30   # >=1 on valid lanes; guard keeps padding at 0
    num = dn[:, _LANES:]

    r = pl.reciprocal(den, approx=True)        # EUP slot
    r = r * (2.0 - den * r)                    # one Newton step -> ~f32 accuracy
    out_ref[...] = (num * r).astype(out_ref.dtype)  # lane-dense 128-wide store


# --------------------------------------------------------------------------- #
# Host-side weight packing (one-time, offline in real use)
# --------------------------------------------------------------------------- #
def pack_smart_attention_params(params, *, output_size, num_clients,
                                param_dtype=jnp.bfloat16):
    """Fuse the 12 raw MultiOutputNet arrays into 6 packed arrays.

    param_dtype=jnp.bfloat16 is recommended on v5e, v6e and v7x alike (the MXU
    is bf16-native on all three; accumulation stays f32 in-kernel).  The 0/1
    selector matrices are exact in bf16.
    """
    (vw0, vb0, vw1, vb1, qw0, qb0, qw1, qb1, kw0, kb0, kw1, kb1) = params
    O, C = output_size, num_clients
    sw = C * O
    assert sw <= _LANES and _LANES % sw == 0, \
        "layout requires num_clients*output_size to divide 128"
    # TODO(synk): C*O > 128 would need a multi-vreg score layout.

    krep = C * C * O
    krep_pad = _round_up(krep, _LANES)
    d_in, Hv = vw0.shape
    Hk = kw0.shape[1]
    d_orig, Hq = qw0.shape
    H = Hv + Hk + Hq
    NW = 2 * krep_pad + _LANES
    scale = 1.0 / math.sqrt(O)
    f32 = jnp.float32

    # Layer 0: block-diagonal over [layer_input | original_input].
    w0 = jnp.zeros((d_in + d_orig, H), f32)
    w0 = w0.at[:d_in, :Hv].set(vw0.astype(f32))
    w0 = w0.at[:d_in, Hv:Hv + Hk].set(kw0.astype(f32))
    w0 = w0.at[d_in:, Hv + Hk:].set(qw0.astype(f32))
    b0 = jnp.concatenate([vb0, kb0, qb0], axis=1).astype(f32)

    # Key second layer replicated so key[b,c,j] sits at lane c*C*O + j*O + o.
    def rep_key(w):  # (R, C*C) -> (R, C*C*O)
        r = w.shape[0]
        w_cj = jnp.transpose(w.reshape(r, C, C), (0, 2, 1)).reshape(r, C * C)
        return jnp.repeat(w_cj, O, axis=1)

    # Layer 1: block-diagonal [key_rep | value | query_rep], 128-padded blocks.
    w1 = jnp.zeros((H, NW), f32)
    w1 = w1.at[:Hv, krep_pad:krep_pad + sw].set(vw1.astype(f32))
    w1 = w1.at[Hv:Hv + Hk, :krep].set(rep_key(kw1).astype(f32))
    w1 = w1.at[Hv + Hk:, krep_pad + _LANES:krep_pad + _LANES + krep].set(
        jnp.tile(qw1 * scale, (1, C)).astype(f32))   # 1/sqrt(O) folded in
    b1 = jnp.zeros((1, NW), f32)
    b1 = b1.at[:, :krep].set(rep_key(kb1).astype(f32))
    b1 = b1.at[:, krep_pad:krep_pad + sw].set(vb1.astype(f32))
    b1 = b1.at[:, krep_pad + _LANES:krep_pad + _LANES + krep].set(
        jnp.tile(qb1 * scale, (1, C)).astype(f32))

    # Static 0/1 selectors.  ssel sums over heads j, laying scores replicated
    # every C*O lanes; tsel sums over clients c (block-diag'd for den|num).
    row = jnp.arange(krep_pad)[:, None]
    col = jnp.arange(_LANES)[None, :]
    ssel = ((row < krep)
            & ((col % sw) == ((row // sw) * O + row % O))).astype(f32)
    row2 = jnp.arange(_LANES)[:, None]
    tsel = ((row2 < sw) & (col == row2 % O)).astype(f32)
    z = jnp.zeros_like(tsel)
    tsel2 = jnp.block([[tsel, z], [z, tsel]])   # (256, 256)

    cast = lambda a: a.astype(param_dtype)      # selectors too (0/1 exact in bf16)
    return tuple(cast(a) for a in (w0, b0, w1, b1, ssel, tsel2))


# --------------------------------------------------------------------------- #
# Wrapper
# --------------------------------------------------------------------------- #
def smart_attention_forward(layer_input, packed_params, original_input=None, *,
                            output_size, num_clients, batch_tile=1024,
                            out_dtype=None):
    if original_input is None:
        original_input = layer_input
    B = layer_input.shape[0]
    xcat = jnp.concatenate([layer_input, original_input], axis=1)
    d_cat = xcat.shape[1]

    w0, b0, w1, b1, ssel, tsel2 = packed_params
    assert d_cat == w0.shape[0], "packed params do not match input widths"
    krep_pad = ssel.shape[0]
    if out_dtype is None:
        out_dtype = w0.dtype   # bf16 output halves HBM write traffic

    # Batch tiling: big tiles for HBM efficiency, but >=2 grid steps when the
    # batch allows it so both TensorCores are used on v7x ("parallel" axis).
    if B > batch_tile:
        tile_b = batch_tile
    elif B <= 8:
        tile_b = B
    else:
        tile_b = min(_round_up(pl.cdiv(B, 2), 8), batch_tile)
    grid = (pl.cdiv(B, tile_b),)

    resident = lambda a: pl.BlockSpec(a.shape, lambda i: (0, 0))  # VMEM-resident
    kernel = functools.partial(smart_attention_kernel,
                               output_size=output_size,
                               num_clients=num_clients,
                               krep_pad=krep_pad)

    out_padded = pl.pallas_call(
        kernel,
        out_shape=jax.ShapeDtypeStruct((B, _LANES), out_dtype),
        grid=grid,
        in_specs=[pl.BlockSpec((tile_b, d_cat), lambda i: (i, 0))]
                 + [resident(a) for a in packed_params],
        out_specs=pl.BlockSpec((tile_b, _LANES), lambda i: (i, 0)),
        compiler_params=pltpu.CompilerParams(
            dimension_semantics=("parallel",)),   # 2-TC sharding on v7x
    )(xcat, *packed_params)
    return out_padded[:, :output_size]


# --------------------------------------------------------------------------- #
# Synthetic MultiOutputNet params + pure-JAX reference
# --------------------------------------------------------------------------- #
def init_multi_output_net(key, in_size, hidden, out_size, num_heads):
    """Deterministic synthetic params. Heads packed along output columns."""
    k0, k1, k2, k3 = jax.random.split(key, 4)
    w0 = jax.random.normal(k0, (in_size, hidden), jnp.float32) / math.sqrt(in_size)
    b0 = 0.01 * jax.random.normal(k1, (1, hidden), jnp.float32)
    w1 = jax.random.normal(k2, (hidden, num_heads * out_size), jnp.float32) / math.sqrt(hidden)
    b1 = 0.01 * jax.random.normal(k3, (1, num_heads * out_size), jnp.float32)
    return w0, b0, w1, b1


def reference_forward(x, orig, params, output_size, num_clients):
    """Pure-JAX reference reproducing the torch forward exactly."""
    (vw0, vb0, vw1, vb1, qw0, qb0, qw1, qb1, kw0, kb0, kw1, kb1) = params
    B = x.shape[0]
    C = num_clients

    def mlp3(inp, w0, b0, w1, b1, out_size):
        h = jnp.maximum(inp @ w0 + b0, 0.0)
        o2 = h @ w1 + b1
        return o2.reshape(B, C, out_size).transpose(0, 2, 1)   # (B, out, C)

    value = mlp3(x, vw0, vb0, vw1, vb1, output_size)            # (B, O, C)
    query = mlp3(orig, qw0, qb0, qw1, qb1, output_size)         # (B, O, C)
    key = mlp3(x, kw0, kb0, kw1, kb1, num_clients)              # (B, C, C)
    scale = 1.0 / math.sqrt(output_size)
    scores = jnp.einsum('boj,bcj->boc', query, key) * scale
    importances = jax.nn.softmax(scores, axis=-1)
    return jnp.sum(importances * value, axis=-1)                # (B, O)


if __name__ == "__main__":
    batch = 2
    input_size = 32
    original_input_size = 32
    hidden = 32
    output_size = 16
    num_clients = 4

    root = jax.random.PRNGKey(0)
    k_in, k_orig, k_v, k_q, k_k = jax.random.split(root, 5)

    layer_input = jax.random.normal(k_in, (batch, input_size), jnp.float32)
    original_input = jax.random.normal(k_orig, (batch, original_input_size), jnp.float32)

    value_params = init_multi_output_net(k_v, input_size, hidden, output_size, num_clients)
    query_params = init_multi_output_net(k_q, original_input_size, hidden, output_size, num_clients)
    key_params = init_multi_output_net(k_k, input_size, hidden, num_clients, num_clients)
    raw_params = (*value_params, *query_params, *key_params)

    ref = reference_forward(layer_input, original_input, raw_params,
                            output_size, num_clients)

    # ---- f32 run: exactness check of the fused layout / packing ----------- #
    packed_f32 = pack_smart_attention_params(
        raw_params, output_size=output_size, num_clients=num_clients,
        param_dtype=jnp.float32)
    out_f32 = smart_attention_forward(layer_input, packed_f32, original_input,
                                      output_size=output_size,
                                      num_clients=num_clients)
    out_f32 = jax.block_until_ready(out_f32)
    assert out_f32.shape == (batch, output_size)
    assert jnp.allclose(out_f32, ref, rtol=1e-4, atol=1e-4), \
        "Pallas kernel (f32) mismatch vs reference"

    # ---- bf16 run: production config (bf16 MXU operands + bf16 output) ---- #
    packed_bf16 = pack_smart_attention_params(
        raw_params, output_size=output_size, num_clients=num_clients,
        param_dtype=jnp.bfloat16)
    out_bf16 = smart_attention_forward(layer_input, packed_bf16, original_input,
                                       output_size=output_size,
                                       num_clients=num_clients)
    out_bf16 = jax.block_until_ready(out_bf16)
    assert out_bf16.shape == (batch, output_size)
    assert out_bf16.dtype == jnp.bfloat16
    # Reference with bf16-rounded weights isolates the in-kernel bf16 error.
    params_rt = tuple(a.astype(jnp.bfloat16).astype(jnp.float32) for a in raw_params)
    ref_bf16 = reference_forward(layer_input, original_input, params_rt,
                                 output_size, num_clients)
    assert jnp.allclose(out_bf16.astype(jnp.float32), ref_bf16,
                        rtol=6e-2, atol=6e-2), \
        "Pallas kernel (bf16) mismatch vs bf16-weight reference"

    print("KERNEL_OK")
</pallas_src>

<mosaic_0001>
module attributes {stable_mosaic.version = 11 : i64} {
  func.func @smart_attention_kernel(%arg0: i32, %arg1: memref<2x64xf32, #tpu.memory_space<vmem>>, %arg2: memref<64x96xf32, #tpu.memory_space<vmem>>, %arg3: memref<1x96xf32, #tpu.memory_space<vmem>>, %arg4: memref<96x640xf32, #tpu.memory_space<vmem>>, %arg5: memref<1x640xf32, #tpu.memory_space<vmem>>, %arg6: memref<256x128xf32, #tpu.memory_space<vmem>>, %arg7: memref<256x256xf32, #tpu.memory_space<vmem>>, %arg8: memref<2x128xf32, #tpu.memory_space<vmem>>) attributes {dimension_semantics = [#tpu.dimension_semantics<parallel>], iteration_bounds = array<i64: 1>, scalar_prefetch = 0 : i64, scratch_operands = 0 : i64, tpu.core_type = #tpu.core_type<tc>, window_params = [{transform_indices = @transform_0, window_bounds = array<i64: 2, 64>}, {pipeline_mode = #tpu.pipeline_mode<synchronous>, transform_indices = @transform_1, window_bounds = array<i64: 64, 96>}, {pipeline_mode = #tpu.pipeline_mode<synchronous>, transform_indices = @transform_2, window_bounds = array<i64: 1, 96>}, {pipeline_mode = #tpu.pipeline_mode<synchronous>, transform_indices = @transform_3, window_bounds = array<i64: 96, 640>}, {pipeline_mode = #tpu.pipeline_mode<synchronous>, transform_indices = @transform_4, window_bounds = array<i64: 1, 640>}, {pipeline_mode = #tpu.pipeline_mode<synchronous>, transform_indices = @transform_5, window_bounds = array<i64: 256, 128>}, {pipeline_mode = #tpu.pipeline_mode<synchronous>, transform_indices = @transform_6, window_bounds = array<i64: 256, 256>}, {transform_indices = @transform_7, window_bounds = array<i64: 2, 128>}]} {
    %c0 = arith.constant 0 : index
    %c0_0 = arith.constant 0 : index
    %0 = vector.load %arg1[%c0, %c0_0] : memref<2x64xf32, #tpu.memory_space<vmem>>, vector<2x64xf32>
    %c0_1 = arith.constant 0 : index
    %c0_2 = arith.constant 0 : index
    %1 = vector.load %arg2[%c0_1, %c0_2] : memref<64x96xf32, #tpu.memory_space<vmem>>, vector<64x96xf32>
    %cst = arith.constant dense<0.000000e+00> : vector<2x96xf32>
    %2 = tpu.matmul %0, %1, %cst {dimension_numbers = #tpu.dot_dimension_numbers<[1], [0], [0], [1], [0, 0, 1, 1], [], []>} : vector<2x64xf32>, vector<64x96xf32>, vector<2x96xf32> -> vector<2x96xf32>
    %c0_3 = arith.constant 0 : index
    %c0_4 = arith.constant 0 : index
    %3 = vector.load %arg3[%c0_3, %c0_4] : memref<1x96xf32, #tpu.memory_space<vmem>>, vector<1x96xf32>
    %4 = vector.broadcast %3 : vector<1x96xf32> to vector<2x96xf32>
    %5 = arith.addf %2, %4 : vector<2x96xf32>
    %cst_5 = arith.constant 0.000000e+00 : f32
    %6 = vector.broadcast %cst_5 : f32 to vector<2x96xf32>
    %7 = arith.maximumf %5, %6 : vector<2x96xf32>
    %c0_6 = arith.constant 0 : index
    %c0_7 = arith.constant 0 : index
    %8 = vector.load %arg4[%c0_6, %c0_7] : memref<96x640xf32, #tpu.memory_space<vmem>>, vector<96x640xf32>
    %cst_8 = arith.constant dense<0.000000e+00> : vector<2x640xf32>
    %9 = tpu.matmul %7, %8, %cst_8 {dimension_numbers = #tpu.dot_dimension_numbers<[1], [0], [0], [1], [0, 0, 1, 1], [], []>} : vector<2x96xf32>, vector<96x640xf32>, vector<2x640xf32> -> vector<2x640xf32>
    %c0_9 = arith.constant 0 : index
    %c0_10 = arith.constant 0 : index
    %10 = vector.load %arg5[%c0_9, %c0_10] : memref<1x640xf32, #tpu.memory_space<vmem>>, vector<1x640xf32>
    %11 = vector.broadcast %10 : vector<1x640xf32> to vector<2x640xf32>
    %12 = arith.addf %9, %11 : vector<2x640xf32>
    %13 = vector.extract_strided_slice %12 {offsets = [0, 0], sizes = [2, 256], strides = [1, 1]} : vector<2x640xf32> to vector<2x256xf32>
    %14 = vector.extract_strided_slice %12 {offsets = [0, 256], sizes = [2, 128], strides = [1, 1]} : vector<2x640xf32> to vector<2x128xf32>
    %15 = vector.extract_strided_slice %12 {offsets = [0, 384], sizes = [2, 256], strides = [1, 1]} : vector<2x640xf32> to vector<2x256xf32>
    %16 = arith.mulf %15, %13 : vector<2x256xf32>
    %c0_11 = arith.constant 0 : index
    %c0_12 = arith.constant 0 : index
    %17 = vector.load %arg6[%c0_11, %c0_12] : memref<256x128xf32, #tpu.memory_space<vmem>>, vector<256x128xf32>
    %cst_13 = arith.constant dense<0.000000e+00> : vector<2x128xf32>
    %18 = tpu.matmul %16, %17, %cst_13 {dimension_numbers = #tpu.dot_dimension_numbers<[1], [0], [0], [1], [0, 0, 1, 1], [], []>} : vector<2x256xf32>, vector<256x128xf32>, vector<2x128xf32> -> vector<2x128xf32>
    %c16_i32 = arith.constant 16 : i32
    %19 = tpu.dynamic_rotate %18 by %c16_i32 dim 1 : vector<2x128xf32>, i32 -> vector<2x128xf32>
    %20 = arith.maximumf %18, %19 : vector<2x128xf32>
    %c32_i32 = arith.constant 32 : i32
    %21 = tpu.dynamic_rotate %20 by %c32_i32 dim 1 : vector<2x128xf32>, i32 -> vector<2x128xf32>
    %22 = arith.maximumf %20, %21 : vector<2x128xf32>
    %23 = arith.subf %18, %22 : vector<2x128xf32>
    %24 = math.exp %23 : vector<2x128xf32>
    %25 = arith.mulf %24, %14 : vector<2x128xf32>
    %26 = tpu.concatenate %24, %25 in 1 : vector<2x128xf32>, vector<2x128xf32> -> vector<2x256xf32>
    %c0_14 = arith.constant 0 : index
    %c0_15 = arith.constant 0 : index
    %27 = vector.load %arg7[%c0_14, %c0_15] : memref<256x256xf32, #tpu.memory_space<vmem>>, vector<256x256xf32>
    %cst_16 = arith.constant dense<0.000000e+00> : vector<2x256xf32>
    %28 = tpu.matmul %26, %27, %cst_16 {dimension_numbers = #tpu.dot_dimension_numbers<[1], [0], [0], [1], [0, 0, 1, 1], [], []>} : vector<2x256xf32>, vector<256x256xf32>, vector<2x256xf32> -> vector<2x256xf32>
    %29 = vector.extract_strided_slice %28 {offsets = [0, 0], sizes = [2, 128], strides = [1, 1]} : vector<2x256xf32> to vector<2x128xf32>
    %cst_17 = arith.constant 1.000000e-30 : f32
    %30 = vector.broadcast %cst_17 : f32 to vector<2x128xf32>
    %31 = arith.addf %29, %30 : vector<2x128xf32>
    %32 = vector.extract_strided_slice %28 {offsets = [0, 128], sizes = [2, 128], strides = [1, 1]} : vector<2x256xf32> to vector<2x128xf32>
    %33 = tpu.reciprocal %31 {approx = true} : vector<2x128xf32> -> vector<2x128xf32>
    %34 = arith.mulf %31, %33 : vector<2x128xf32>
    %cst_18 = arith.constant 2.000000e+00 : f32
    %35 = vector.broadcast %cst_18 : f32 to vector<2x128xf32>
    %36 = arith.subf %35, %34 : vector<2x128xf32>
    %37 = arith.mulf %33, %36 : vector<2x128xf32>
    %38 = arith.mulf %32, %37 : vector<2x128xf32>
    %c0_19 = arith.constant 0 : index
    %c0_20 = arith.constant 0 : index
    %39 = vector.load %arg8[%c0_19, %c0_20] : memref<2x128xf32, #tpu.memory_space<vmem>>, vector<2x128xf32>
    tpu.vector_store %arg8[%c0_19, %c0_20], %38 {strides = array<i32>} : memref<2x128xf32, #tpu.memory_space<vmem>>, vector<2x128xf32>,
    return
  }
  func.func @transform_0(%arg0: i32) -> (i32, i32) {
    %c0_i32 = arith.constant 0 : i32
    %c0_i32_0 = arith.constant 0 : i32
    return %arg0, %c0_i32 : i32, i32
  }
  func.func @transform_1(%arg0: i32) -> (i32, i32) {
    %c0_i32 = arith.constant 0 : i32
    %c0_i32_0 = arith.constant 0 : i32
    %c0_i32_1 = arith.constant 0 : i32
    return %c0_i32, %c0_i32_0 : i32, i32
  }
  func.func @transform_2(%arg0: i32) -> (i32, i32) {
    %c0_i32 = arith.constant 0 : i32
    %c0_i32_0 = arith.constant 0 : i32
    %c0_i32_1 = arith.constant 0 : i32
    return %c0_i32, %c0_i32_0 : i32, i32
  }
  func.func @transform_3(%arg0: i32) -> (i32, i32) {
    %c0_i32 = arith.constant 0 : i32
    %c0_i32_0 = arith.constant 0 : i32
    %c0_i32_1 = arith.constant 0 : i32
    return %c0_i32, %c0_i32_0 : i32, i32
  }
  func.func @transform_4(%arg0: i32) -> (i32, i32) {
    %c0_i32 = arith.constant 0 : i32
    %c0_i32_0 = arith.constant 0 : i32
    %c0_i32_1 = arith.constant 0 : i32
    return %c0_i32, %c0_i32_0 : i32, i32
  }
  func.func @transform_5(%arg0: i32) -> (i32, i32) {
    %c0_i32 = arith.constant 0 : i32
    %c0_i32_0 = arith.constant 0 : i32
    %c0_i32_1 = arith.constant 0 : i32
    return %c0_i32, %c0_i32_0 : i32, i32
  }
  func.func @transform_6(%arg0: i32) -> (i32, i32) {
    %c0_i32 = arith.constant 0 : i32
    %c0_i32_0 = arith.constant 0 : i32
    %c0_i32_1 = arith.constant 0 : i32
    return %c0_i32, %c0_i32_0 : i32, i32
  }
  func.func @transform_7(%arg0: i32) -> (i32, i32) {
    %c0_i32 = arith.constant 0 : i32
    %c0_i32_0 = arith.constant 0 : i32
    return %arg0, %c0_i32 : i32, i32
  }
}

</mosaic_0001>

<bundles_post_ra>
// kernel: tpu_custom_call.1
= control target key start
LH: loop header
LB: loop body
LE: loop exit
PB: predicated region body
PF: predicated region fallthrough
CT: control target
= control target key end

     0   :  { %12 = vsyncpa [#allocation3], 0  ;;  %s1377_s0 = inlined_call_operand.hbm [shape: f32[2,64], index: 0, kind: input, shape index: {}]   ;;  %s1378_s1 = inlined_call_operand.hbm [shape: f32[64,96], index: 1, kind: input, shape index: {}]   ;;  %s1379_s2 = inlined_call_operand.vmem [shape: f32[1,96], index: 2, kind: input, shape index: {}]   ;;  %s1380_s3 = inlined_call_operand.hbm [shape: f32[96,640], index: 3, kind: input, shape index: {}]   ;;  %s1381_s4 = inlined_call_operand.vmem [shape: f32[1,640], index: 4, kind: input, shape index: {}]   ;;  %s1382_s5 = inlined_call_operand.hbm [shape: f32[256,128], index: 5, kind: input, shape index: {}]   ;;  %s1383_s6 = inlined_call_operand.hbm [shape: f32[256,256], index: 6, kind: input, shape index: {}]   ;;  %s1384_s7 = inlined_call_operand.hbm [shape: f32[2,128], index: 7, kind: output, shape index: {}]  }
   0x1   :  { %13 = vsyncpa [#allocation6], 0 }
   0x2   :  { %14 = vsyncpa [#allocation9], 0 }
   0x3   :  { %15 = vsyncpa [#allocation4], 0  ;;  %s1202_s24 = smov [#allocation5]   ;;  %s1062_s28 = scalar_lea.hbm %s1378_s1, 1024 }
   0x4   :  { %s31_s25 = sshll.u32 %s1202_s24, 4  ;;  %p1063_p0 = scmp.ne.s32.totalorder %s1378_s1, %s1062_s28  ;;  %s32_s25 = int_to_ptr.vmem [resolvable:$true] %s31_s25 }
   0x5   :  { %p1066_p1 = scmp.lt.u32.totalorder %s1062_s28, %s1378_s1 }
   0x7   :  { %p1068_p2 = pnand %p1066_p1, %p1063_p0 }
   0x9   :  { %1071 = shalt.err (!%p1068_p2)
}
   0xa   :  { %s1072_s10 = scalar_lea.vmem %s32_s25, 1024  ;;  %p1077_p4 = scmp.lt.s32.totalorder %s32_s25, %s32_s25 }
   0xb   :  { %p1073_p3 = scmp.ne.s32.totalorder %s32_s25, %s1072_s10  ;;  %p1078_p5 = scmp.lt.s32.totalorder %s1072_s10, %s1072_s10 }
   0xd   :  { %p1079_p6 = por %p1078_p5, %p1077_p4 }
   0xf   :  { %p1080_p7 = pnand %p1079_p6, %p1073_p3 }
  0x11   :  { %1083 = shalt.err (!%p1080_p7)
}
  0x12   :  { %s1203_s11 = smov 128   ;;  %s1204_s12 = smov 8  }
  0x13   :  { %37 = dma.hbm_to_vmem [thread:$0]  %s1378_s1, 1024, %s32_s25, [#allocation6], %s1203_s11, %s1203_s11, %s1204_s12  }
  0x14   :  { %s1205_s15 = smov [#allocation8]   ;;  %s1206_s17 = smov [#allocation2]  }
  0x15   :  { %s59_s16 = sshll.u32 %s1205_s15, 4  ;;  %s22_s18 = sshll.u32 %s1206_s17, 4  ;;  %s60_s16 = int_to_ptr.vmem [resolvable:$true] %s59_s16  ;;  %s23_s18 = int_to_ptr.vmem [resolvable:$true] %s22_s18 }
  0x16   :  { %s1084_s21 = scalar_lea.hbm %s1382_s5, 4096 }
  0x17   :  { %p1085_p8 = scmp.ne.s32.totalorder %s1382_s5, %s1084_s21  ;;  %p1088_p9 = scmp.lt.u32.totalorder %s1084_s21, %s1382_s5 }
  0x19   :  { %p1090_p10 = pnand %p1088_p9, %p1085_p8 }
  0x1b   :  { %1093 = shalt.err (!%p1090_p10)
}
  0x1c   :  { %s1094_s1 = scalar_lea.vmem %s60_s16, 4096  ;;  %p1099_p12 = scmp.lt.s32.totalorder %s60_s16, %s60_s16 }
  0x1d   :  { %p1095_p11 = scmp.ne.s32.totalorder %s60_s16, %s1094_s1  ;;  %p1100_p13 = scmp.lt.s32.totalorder %s1094_s1, %s1094_s1 }
  0x1f   :  { %p1101_p0 = por %p1100_p13, %p1099_p12 }
  0x21   :  { %p1102_p1 = pnand %p1101_p0, %p1095_p11 }
  0x23   :  { %1105 = shalt.err (!%p1102_p1)
}
  0x24   :  { %65 = dma.hbm_to_vmem [thread:$0]  %s1382_s5, 4096, %s60_s16, [#allocation9], %s1203_s11, %s1203_s11, %s1204_s12  }
  0x25   :  { %s1106_s30 = scalar_lea.hbm %s1377_s0, 32 }
  0x26   :  { %p1107_p2 = scmp.ne.s32.totalorder %s1377_s0, %s1106_s30  ;;  %p1110_p3 = scmp.lt.u32.totalorder %s1106_s30, %s1377_s0 }
  0x28   :  { %p1112_p4 = pnand %p1110_p3, %p1107_p2 }
  0x2a   :  { %1115 = shalt.err (!%p1112_p4)
}
  0x2b   :  { %s1116_s14 = scalar_lea.vmem %s23_s18, 32  ;;  %p1121_p6 = scmp.lt.s32.totalorder %s23_s18, %s23_s18 }
  0x2c   :  { %p1117_p5 = scmp.ne.s32.totalorder %s23_s18, %s1116_s14  ;;  %p1122_p7 = scmp.lt.s32.totalorder %s1116_s14, %s1116_s14 }
  0x2e   :  { %p1123_p8 = por %p1122_p7, %p1121_p6 }
  0x30   :  { %p1124_p9 = pnand %p1123_p8, %p1117_p5 }
  0x32   :  { %1127 = shalt.err (!%p1124_p9)
}
  0x33   :  { %25 = dma.hbm_to_vmem [thread:$0]  %s1377_s0, 32, %s23_s18, [#allocation3]  }
  0x34   :  { %s1207_s12 = smov [#allocation7]   ;;  %s1128_s19 = scalar_lea.hbm %s1380_s3, 7680 }
  0x35   :  { %s45_s15 = sshll.u32 %s1207_s12, 4  ;;  %p1129_p10 = scmp.ne.s32.totalorder %s1380_s3, %s1128_s19  ;;  %s46_s15 = int_to_ptr.vmem [resolvable:$true] %s45_s15 }
  0x36   :  { %p1132_p11 = scmp.lt.u32.totalorder %s1128_s19, %s1380_s3 }
  0x38   :  { %p1134_p12 = pnand %p1132_p11, %p1129_p10 }
  0x3a   :  { %1137 = shalt.err (!%p1134_p12)
}
  0x3b   :  { %s1138_s24 = scalar_lea.vmem %s46_s15, 7680  ;;  %p1143_p0 = scmp.lt.s32.totalorder %s46_s15, %s46_s15 }
  0x3c   :  { %p1139_p13 = scmp.ne.s32.totalorder %s46_s15, %s1138_s24  ;;  %p1144_p1 = scmp.lt.s32.totalorder %s1138_s24, %s1138_s24 }
  0x3e   :  { %p1145_p2 = por %p1144_p1, %p1143_p0 }
  0x40   :  { %p1146_p3 = pnand %p1145_p2, %p1139_p13 }
  0x42   :  { %1149 = shalt.err (!%p1146_p3)
}
  0x43   :  { %s1208_s0 = smov 640   ;;  %s1209_s18 = smov 40  }
  0x44   :  { %51 = dma.hbm_to_vmem [thread:$0]  %s1380_s3, 7680, %s46_s15, [#allocation6], %s1208_s0, %s1208_s0, %s1209_s18  }
  0x45   :  { %s1210_s25 = smov [#allocation10]   ;;  %s1150_s30 = scalar_lea.hbm %s1383_s6, 8192 }
  0x46   :  { %s71_s27 = sshll.u32 %s1210_s25, 4  ;;  %p1151_p4 = scmp.ne.s32.totalorder %s1383_s6, %s1150_s30  ;;  %s72_s27 = int_to_ptr.vmem [resolvable:$true] %s71_s27 }
  0x47   :  { %p1154_p5 = scmp.lt.u32.totalorder %s1150_s30, %s1383_s6 }
  0x49   :  { %p1156_p6 = pnand %p1154_p5, %p1151_p4 }
  0x4b   :  { %1159 = shalt.err (!%p1156_p6)
}
  0x4c   :  { %s1160_s14 = scalar_lea.vmem %s72_s27, 8192  ;;  %p1165_p8 = scmp.lt.s32.totalorder %s72_s27, %s72_s27 }
  0x4d   :  { %p1161_p7 = scmp.ne.s32.totalorder %s72_s27, %s1160_s14  ;;  %p1166_p9 = scmp.lt.s32.totalorder %s1160_s14, %s1160_s14 }
  0x4f   :  { %p1167_p10 = por %p1166_p9, %p1165_p8 }
  0x51   :  { %p1168_p11 = pnand %p1167_p10, %p1161_p7 }
  0x53   :  { %1171 = shalt.err (!%p1168_p11)
}
  0x54   :  { %s1211_s3 = smov 256   ;;  %s1212_s5 = smov 16  }
  0x55   :  { %77 = dma.hbm_to_vmem [thread:$0]  %s1383_s6, 8192, %s72_s27, [#allocation9], %s1211_s3, %s1211_s3, %s1212_s5  }
  0x56   :  { %1194 = dma.done.wait [#allocation3], 32  }
  0x57   :  { %1195 = vsyncadd [#allocation3], 4294967264 }
  0x58   :  { %1196 = dma.done.wait [#allocation6], 8704  }
  0x59   :  { %1197 = vsyncadd [#allocation6], 4294958592 }
  0x5a   :  { %1198 = dma.done.wait [#allocation9], 12288  }
  0x5b   :  { %1199 = vsyncadd [#allocation9], 4294955008  ;;  %v1213_v0 = vmov 0.0|0.0   ;;  %vm1214_vm0 = vmmov 0   ;;  %v1215_v1 = vmov 0.0   ;;  %v94_v2 = vld [vmem:[#allocation5] sm:$0xff] }
  0x5c   :  { %868 = vmatprep.subr.bf16.mxu0 %v1213_v0  ;;  %838 = vmatprep.mubr.msk.f32.mxu0 %vm1214_vm0, %v1215_v1  ;;  %v95_v3 = vld [vmem:[#allocation5 + $0x8] sm:$0xff]  ;;  %v96_v4 = vld [vmem:[#allocation5 + $0x10] sm:$0xff]  ;;  %v97_v6 = vld [vmem:[#allocation5 + $0x18] sm:$0xff]  ;;  %vm109_vm1 = vcmask 523264   ;;  %vm271_vm2 = vcmask 785408   ;;  %s1217_s17 = smov [#allocation11]  }
  0x5d   :  { %928 = vmatprep.subr.bf16.mxu1 %v1213_v0  ;;  %865 = vmatprep.mubr.msk.f32.mxu1 %vm1214_vm0, %v1215_v1  ;;  %v869_v5 = vpack.c.bf16 %v95_v3, %v94_v2  ;;  %v872_v7 = vpack.c.bf16 %v97_v6, %v96_v4  ;;  %v98_v8 = vld [vmem:[#allocation5 + $0x20] sm:$0xff]  ;;  %v99_v9 = vld [vmem:[#allocation5 + $0x28] sm:$0xff]  ;;  %v198_v13 = vld [vmem:[#allocation7 + $0x70] sm:$0xff]  ;;  %s749_s19 = sshll.u32 %s1217_s17, 4  ;;  %s750_s19 = int_to_ptr.vmem [resolvable:$true] %s749_s19 }
  0x5e   :  { %v188_v10 = vld [vmem:[#allocation7 + $0x20] sm:$0xff]  ;;  %v193_v11 = vld [vmem:[#allocation7 + $0x48] sm:$0xff]  ;;  %v203_v14 = vld [vmem:[#allocation7 + $0x98] sm:$0xff]  ;;  %v875_v15 = vpack.c.bf16 %v99_v9, %v98_v8  ;;  %s1172_s20 = scalar_lea.vmem %s750_s19, 32  ;;  %p1177_p13 = scmp.lt.s32.totalorder %s750_s19, %s750_s19 }
  0x5f   :  { %870 = vmatpush3.bf16.msra.mxu0 %v869_v5  ;;  %v929_v12 = vpack.c.bf16 %v193_v11, %v188_v10  ;;  %v100_v16 = vld [vmem:[#allocation5 + $0x30] sm:$0xff]  ;;  %v932_v17 = vpack.c.bf16 %v203_v14, %v198_v13  ;;  %v101_v18 = vld [vmem:[#allocation5 + $0x38] sm:$0xff]  ;;  %v208_v19 = vld [vmem:[#allocation7 + $0xc0] sm:$0xff]  ;;  %p1173_p12 = scmp.ne.s32.totalorder %s750_s19, %s1172_s20  ;;  %p1178_p0 = scmp.lt.s32.totalorder %s1172_s20, %s1172_s20 }
  0x60   :  { %871 = vmatprep.subr.bf16.mxu0 %v1213_v0  ;;  %v213_v20 = vld [vmem:[#allocation7 + $0xe8] sm:$0xff]  ;;  %v190_v22 = vld [vmem:[#allocation7 + $0x30] sm:$0xff]  ;;  %v878_v23 = vpack.c.bf16 %v101_v18, %v100_v16  ;;  %v184_v24 = vld [vmem:[#allocation7] sm:$0xff] }
  0x61   :  { %930 = vmatpush3.bf16.msra.mxu1 %v929_v12  ;;  %v185_v21 = vld [vmem:[#allocation7 + $0x8] sm:$0xff]  ;;  %v935_v25 = vpack.c.bf16 %v213_v20, %v208_v19  ;;  %v218_v28 = vld [vmem:[#allocation7 + $0x110] sm:$0xff]  ;;  %v223_v29 = vld [vmem:[#allocation7 + $0x138] sm:$0xff]  ;;  %p1179_p1 = por %p1178_p0, %p1177_p13 }
  0x62   :  { %931 = vmatprep.subr.bf16.mxu1 %v1213_v0  ;;  %v880_v26 = vpack.c.bf16 %v190_v22, %v185_v21  ;;  %v189_v27 = vld [vmem:[#allocation7 + $0x28] sm:$0xff]  ;;  %v195_v30 = vld [vmem:[#allocation7 + $0x58] sm:$0xff]  ;;  %v200_v31 = vld [vmem:[#allocation7 + $0x80] sm:$0xff]  ;;  %v938_v35 = vpack.c.bf16 %v223_v29, %v218_v28 }
  0x63   :  { %873 = vmatpush3.bf16.msra.mxu0 %v872_v7  ;;  %v93_v32 = vld [vmem:[#allocation2] sm:$0x3]  ;;  %v882_v33 = vpack.c.bf16 %v189_v27, %v184_v24  ;;  %v194_v34 = vld [vmem:[#allocation7 + $0x50] sm:$0xff]  ;;  %v884_v36 = vpack.c.bf16 %v200_v31, %v195_v30  ;;  %v228_v38 = vld [vmem:[#allocation7 + $0x160] sm:$0xff]  ;;  %p1180_p2 = pnand %p1179_p1, %p1173_p12 }
  0x64   :  { %874 = vmatprep.subr.bf16.mxu0 %v1213_v0  ;;  %v199_v37 = vld [vmem:[#allocation7 + $0x78] sm:$0xff]  ;;  %v233_v39 = vld [vmem:[#allocation7 + $0x188] sm:$0xff]  ;;  %v210_v41 = vld [vmem:[#allocation7 + $0xd0] sm:$0xff] }
  0x65   :  { %933 = vmatpush3.bf16.msra.mxu1 %v932_v17  ;;  %v205_v40 = vld [vmem:[#allocation7 + $0xa8] sm:$0xff]  ;;  %v886_v42 = vpack.c.bf16 %v199_v37, %v194_v34  ;;  %v941_v43 = vpack.c.bf16 %v233_v39, %v228_v38  ;;  %v204_v45 = vld [vmem:[#allocation7 + $0xa0] sm:$0xff]  ;;  %v215_v47 = vld [vmem:[#allocation7 + $0xf8] sm:$0xff] }
  0x66   :  { %934 = vmatprep.subr.bf16.mxu1 %v1213_v0  ;;  %v888_v44 = vpack.c.bf16 %v210_v41, %v205_v40  ;;  %v209_v46 = vld [vmem:[#allocation7 + $0xc8] sm:$0xff]  ;;  %v220_v48 = vld [vmem:[#allocation7 + $0x120] sm:$0xff]  ;;  %v214_v51 = vld [vmem:[#allocation7 + $0xf0] sm:$0xff] }
  0x67   :  { %876 = vmatpush3.bf16.msra.mxu0 %v875_v15  ;;  %v890_v49 = vpack.c.bf16 %v209_v46, %v204_v45  ;;  %v892_v50 = vpack.c.bf16 %v220_v48, %v215_v47  ;;  %v219_v52 = vld [vmem:[#allocation7 + $0x118] sm:$0xff]  ;;  %v225_v53 = vld [vmem:[#allocation7 + $0x148] sm:$0xff]  ;;  %v230_v54 = vld [vmem:[#allocation7 + $0x170] sm:$0xff] }
  0x68   :  { %877 = vmatprep.subr.bf16.mxu0 %v1213_v0  ;;  %v894_v55 = vpack.c.bf16 %v219_v52, %v214_v51  ;;  %v896_v56 = vpack.c.bf16 %v230_v54, %v225_v53  ;;  %v224_v57 = vld [vmem:[#allocation7 + $0x140] sm:$0xff]  ;;  %v229_v58 = vld [vmem:[#allocation7 + $0x168] sm:$0xff]  ;;  %v235_v60 = vld [vmem:[#allocation7 + $0x198] sm:$0xff] }
  0x69   :  { %936 = vmatpush3.bf16.msra.mxu1 %v935_v25  ;;  %v898_v59 = vpack.c.bf16 %v229_v58, %v224_v57  ;;  %v240_v61 = vld [vmem:[#allocation7 + $0x1c0] sm:$0xff]  ;;  %v234_v63 = vld [vmem:[#allocation7 + $0x190] sm:$0xff]  ;;  %v239_v2 = vld [vmem:[#allocation7 + $0x1b8] sm:$0xff] }
  0x6a   :  { %937 = vmatprep.subr.bf16.mxu1 %v1213_v0  ;;  %v900_v62 = vpack.c.bf16 %v240_v61, %v235_v60  ;;  %v902_v3 = vpack.c.bf16 %v239_v2, %v234_v63  ;;  %v238_v4 = vld [vmem:[#allocation7 + $0x1b0] sm:$0xff]  ;;  %v187_v6 = vld [vmem:[#allocation7 + $0x18] sm:$0xff]  ;;  %v192_v7 = vld [vmem:[#allocation7 + $0x40] sm:$0xff] }
  0x6b   :  { %879 = vmatpush3.bf16.msra.mxu0 %v878_v23  ;;  %v904_v8 = vpack.c.bf16 %v192_v7, %v187_v6  ;;  %v760_v9 = vld [vmem:[%s1379_s2] ss:$0 sm:$0xff]  ;;  %v191_v11 = vld [vmem:[#allocation7 + $0x38] sm:$0xff]  ;;  %v197_v13 = vld [vmem:[#allocation7 + $0x68] sm:$0xff] }
  0x6c   :  { %881 = vmatprep.subr.bf16.mxu0 %v880_v26  ;;  %v186_v10 = vld [vmem:[#allocation7 + $0x10] sm:$0xff]  ;;  %v196_v20 = vld [vmem:[#allocation7 + $0x60] sm:$0xff]  ;;  %v201_v21 = vld [vmem:[#allocation7 + $0x88] sm:$0xff] }
  0x6d   :  { %939 = vmatpush3.bf16.msra.mxu1 %v938_v35  ;;  %v202_v14 = vld [vmem:[#allocation7 + $0x90] sm:$0xff]  ;;  %v906_v17 = vpack.c.bf16 %v191_v11, %v186_v10  ;;  %v207_v22 = vld [vmem:[#allocation7 + $0xb8] sm:$0xff]  ;;  %v212_v23 = vld [vmem:[#allocation7 + $0xe0] sm:$0xff]  ;;  %v910_v24 = vpack.c.bf16 %v201_v21, %v196_v20 }
  0x6e   :  { %839 = vmatmul.mubr.msk.f32.vlgmr.msra.gmra.mrb[0].mxu0 %vm109_vm1, %v93_v32  ;;  %940 = vmatprep.subr.bf16.mxu1 %v1213_v0  ;;  %v908_v19 = vpack.c.bf16 %v202_v14, %v197_v13  ;;  %v912_v25 = vpack.c.bf16 %v212_v23, %v207_v22  ;;  %v206_v26 = vld [vmem:[#allocation7 + $0xb0] sm:$0xff]  ;;  %v211_v27 = vld [vmem:[#allocation7 + $0xd8] sm:$0xff]  ;;  %v217_v28 = vld [vmem:[#allocation7 + $0x108] sm:$0xff] }
  0x6f   :  { %883 = vmatpush1.bf16.msra.mxu0 %v882_v33  ;;  %339 = vmatprep.mubr.f32.mxu0 %v1215_v1  ;;  %v222_v29 = vld [vmem:[#allocation7 + $0x130] sm:$0xff]  ;;  %v914_v30 = vpack.c.bf16 %v211_v27, %v206_v26  ;;  %v216_v32 = vld [vmem:[#allocation7 + $0x100] sm:$0xff]  ;;  %v221_v33 = vld [vmem:[#allocation7 + $0x128] sm:$0xff] }
  0x70   :  { %885 = vmatprep.subr.bf16.mxu0 %v884_v36  ;;  %v916_v31 = vpack.c.bf16 %v222_v29, %v217_v28  ;;  %v227_v34 = vld [vmem:[#allocation7 + $0x158] sm:$0xff]  ;;  %v232_v35 = vld [vmem:[#allocation7 + $0x180] sm:$0xff]  ;;  %v918_v36 = vpack.c.bf16 %v221_v33, %v216_v32  ;;  %v226_v38 = vld [vmem:[#allocation7 + $0x150] sm:$0xff] }
  0x71   :  { %942 = vmatpush3.bf16.msra.mxu1 %v941_v43  ;;  %v920_v37 = vpack.c.bf16 %v232_v35, %v227_v34  ;;  %v237_v39 = vld [vmem:[#allocation7 + $0x1a8] sm:$0xff]  ;;  %v242_v40 = vld [vmem:[#allocation7 + $0x1d0] sm:$0xff]  ;;  %v236_v43 = vld [vmem:[#allocation7 + $0x1a0] sm:$0xff] }
  0x72   :  { %943 = vmatprep.subr.bf16.mxu1 %v1213_v0  ;;  %v243_v0 = vld [vmem:[#allocation7 + $0x1d8] sm:$0xff]  ;;  %v505_v45 = vld [vmem:[#allocation8 + $0x80] sm:$0xff]  ;;  %v506_v46 = vld [vmem:[#allocation8 + $0x88] sm:$0xff] }
  0x73   :  { %887 = vmatpush1.bf16.msra.mxu0 %v886_v42  ;;  %v944_v5 = vpack.c.bf16 %v243_v0, %v238_v4  ;;  %v924_v42 = vpack.c.bf16 %v242_v40, %v237_v39  ;;  %v946_v48 = vpack.c.bf16 %v506_v46, %v505_v45  ;;  %v507_v52 = vld [vmem:[#allocation8 + $0x90] sm:$0xff]  ;;  %v508_v53 = vld [vmem:[#allocation8 + $0x98] sm:$0xff]  ;;  %v509_v58 = vld [vmem:[#allocation8 + $0xa0] sm:$0xff] }
  0x74   :  { %889 = vmatprep.subr.bf16.mxu0 %v888_v44  ;;  %v241_v44 = vld [vmem:[#allocation7 + $0x1c8] sm:$0xff]  ;;  %v950_v54 = vpack.c.bf16 %v508_v53, %v507_v52  ;;  %v493_v61 = vld [vmem:[#allocation8 + $0x20] sm:$0xff]  ;;  %v511_v2 = vld [vmem:[#allocation8 + $0xb0] sm:$0xff] }
  0x75   :  { %945 = vmatpush3.bf16.msra.mxu1 %v944_v5  ;;  %v926_v47 = vpack.c.bf16 %v241_v44, %v236_v43  ;;  %v495_v4 = vld [vmem:[#allocation8 + $0x30] sm:$0xff]  ;;  %v496_v5 = vld [vmem:[#allocation8 + $0x38] sm:$0xff]  ;;  %v513_v6 = vld [vmem:[#allocation8 + $0xc0] sm:$0xff] }
  0x76   :  { %v514_v7 = vld [vmem:[#allocation8 + $0xc8] sm:$0xff]  ;;  %v497_v10 = vld [vmem:[#allocation8 + $0x40] sm:$0xff]  ;;  %v516_v13 = vld [vmem:[#allocation8 + $0xd8] sm:$0xff] }
  0x77   :  { %891 = vmatpush1.bf16.msra.mxu0 %v890_v49  ;;  %v489_v49 = vld [vmem:[#allocation8] sm:$0xff]  ;;  %v498_v11 = vld [vmem:[#allocation8 + $0x48] sm:$0xff]  ;;  %v520_v26 = vld [vmem:[#allocation8 + $0xf8] sm:$0xff] }
  0x78   :  { %893 = vmatprep.subr.bf16.mxu0 %v892_v50  ;;  %v490_v50 = vld [vmem:[#allocation8 + $0x8] sm:$0xff]  ;;  %v964_v14 = vpack.c.bf16 %v498_v11, %v497_v10  ;;  %v501_v22 = vld [vmem:[#allocation8 + $0x60] sm:$0xff]  ;;  %v503_v28 = vld [vmem:[#allocation8 + $0x70] sm:$0xff] }
  0x79   :  { %v948_v51 = vpack.c.bf16 %v490_v50, %v489_v49  ;;  %v502_v23 = vld [vmem:[#allocation8 + $0x68] sm:$0xff]  ;;  %v504_v29 = vld [vmem:[#allocation8 + $0x78] sm:$0xff] }
  0x7a   :  { %v1345_v34 = vld [vmem:[%s1381_s4] sm:$0x1f]  ;;  %v602_v53 = vld [vmem:[#allocation10 + $0x8] sm:$0xff]  ;;  %s1216_s4 = smov 32  }
  0x7b   :  { %895 = vmatpush1.bf16.msra.mxu0 %v894_v55  ;;  %v491_v55 = vld [vmem:[#allocation8 + $0x10] sm:$0xff] }
  0x7c   :  { %897 = vmatprep.subr.bf16.mxu0 %v896_v56  ;;  %v492_v56 = vld [vmem:[#allocation8 + $0x18] sm:$0xff] }
  0x7d   :  { %v952_v57 = vpack.c.bf16 %v492_v56, %v491_v55  ;;  %v601_v55 = vld [vmem:[#allocation10] sm:$0xff] }
  0x7f   :  { %899 = vmatpush1.bf16.msra.mxu0 %v898_v59  ;;  %v510_v59 = vld [vmem:[#allocation8 + $0xa8] sm:$0xff] }
  0x80   :  { %901 = vmatprep.subr.bf16.mxu0 %v900_v62  ;;  %v954_v60 = vpack.c.bf16 %v510_v59, %v509_v58  ;;  %v494_v62 = vld [vmem:[#allocation8 + $0x28] sm:$0xff]  ;;  %v608_v59 = vld [vmem:[#allocation10 + $0x38] sm:$0xff] }
  0x81   :  { %v956_v63 = vpack.c.bf16 %v494_v62, %v493_v61  ;;  %v606_v58 = vld [vmem:[#allocation10 + $0x28] sm:$0xff]  ;;  %v605_v62 = vld [vmem:[#allocation10 + $0x20] sm:$0xff] }
  0x82   :  { %v982_v61 = vpack.c.bf16 %v608_v59, %v606_v58  ;;  %v641_v58 = vld [vmem:[#allocation10 + $0x140] sm:$0xff]  ;;  %v643_v59 = vld [vmem:[#allocation10 + $0x150] sm:$0xff] }
  0x83   :  { %903 = vmatpush1.bf16.msra.mxu0 %v902_v3  ;;  %v512_v3 = vld [vmem:[#allocation8 + $0xb8] sm:$0xff] }
  0x84   :  { %905 = vmatprep.subr.bf16.mxu0 %v904_v8  ;;  %v958_v0 = vpack.c.bf16 %v512_v3, %v511_v2  ;;  %v960_v8 = vpack.c.bf16 %v496_v5, %v495_v4  ;;  %v610_v2 = vld [vmem:[#allocation10 + $0x48] sm:$0xff]  ;;  %v612_v3 = vld [vmem:[#allocation10 + $0x58] sm:$0xff]  ;;  %v609_v5 = vld [vmem:[#allocation10 + $0x40] sm:$0xff] }
 0x141   :  { %v179_v12 = vpop.f32.mrb[0].mxu0 }
 0x142   :  { %v180_v15 = vadd.f32 %v760_v9, %v179_v12  ;;  %v840_v16 = vpop.f32.mrb[1].mxu0  ;;  %v962_v9 = vpack.c.bf16 %v514_v7, %v513_v6  ;;  %v515_v12 = vld [vmem:[#allocation8 + $0xd0] sm:$0xff]  ;;  %v614_v7 = vld [vmem:[#allocation10 + $0x68] sm:$0xff] }
 0x143   :  { %v499_v16 = vld [vmem:[#allocation8 + $0x50] sm:$0xff] }
 0x144   :  { %v183_v18 = vmax.f32 %v180_v15, 0.0  ;;  %v966_v15 = vpack.c.bf16 %v516_v13, %v515_v12  ;;  %v611_v6 = vld [vmem:[#allocation10 + $0x50] sm:$0xff] }
 0x145   :  { %v988_v11 = vpack.c.bf16 %v611_v6, %v609_v5  ;;  %v652_v5 = vld [vmem:[#allocation10 + $0x198] sm:$0xff] }
 0x146   :  { %762 = vmatmul.mubr.msk.f32.vlgmr.msra.gmra.mrb[2].mxu0 %vm271_vm2, %v183_v18  ;;  %866 = vmatmul.mubr.msk.f32.vlgmr.msra.gmra.mrb[0].mxu1 %vm271_vm2, %v183_v18 }
 0x147   :  { %907 = vmatpush1.bf16.msra.mxu0 %v906_v17  ;;  %410 = vmatprep.mubr.f32.mxu0 %v1215_v1  ;;  %v231_v1 = vld [vmem:[#allocation7 + $0x178] sm:$0xff] }
 0x148   :  { %909 = vmatprep.subr.bf16.mxu0 %v908_v19  ;;  %v922_v41 = vpack.c.bf16 %v231_v1, %v226_v38  ;;  %v500_v17 = vld [vmem:[#allocation8 + $0x58] sm:$0xff]  ;;  %v518_v19 = vld [vmem:[#allocation8 + $0xe8] sm:$0xff] }
 0x149   :  { %v968_v20 = vpack.c.bf16 %v500_v17, %v499_v16  ;;  %v618_v16 = vld [vmem:[#allocation10 + $0x88] sm:$0xff]  ;;  %v620_v17 = vld [vmem:[#allocation10 + $0x98] sm:$0xff] }
 0x14b   :  { %911 = vmatpush1.bf16.msra.mxu0 %v910_v24  ;;  %v972_v24 = vpack.c.bf16 %v502_v23, %v501_v22  ;;  %v622_v22 = vld [vmem:[#allocation10 + $0xa8] sm:$0xff]  ;;  %v624_v23 = vld [vmem:[#allocation10 + $0xb8] sm:$0xff] }
 0x14c   :  { %913 = vmatprep.subr.bf16.mxu0 %v912_v25  ;;  %v519_v25 = vld [vmem:[#allocation8 + $0xf0] sm:$0xff] }
 0x14d   :  { %v974_v27 = vpack.c.bf16 %v520_v26, %v519_v25  ;;  %v998_v25 = vpack.c.bf16 %v624_v23, %v622_v22  ;;  %v621_v26 = vld [vmem:[#allocation10 + $0xa0] sm:$0xff]  ;;  %v662_v22 = vld [vmem:[#allocation10 + $0x1e8] sm:$0xff]  ;;  %v664_v23 = vld [vmem:[#allocation10 + $0x1f8] sm:$0xff] }
 0x14f   :  { %915 = vmatpush1.bf16.msra.mxu0 %v914_v30  ;;  %v976_v30 = vpack.c.bf16 %v504_v29, %v503_v28  ;;  %v626_v28 = vld [vmem:[#allocation10 + $0xc8] sm:$0xff]  ;;  %v628_v29 = vld [vmem:[#allocation10 + $0xd8] sm:$0xff] }
 0x150   :  { %917 = vmatprep.subr.bf16.mxu0 %v916_v31  ;;  %v246_v31 = vlaneseq }
 0x152   :  { %v1339_v32 = vshrl.u32 %v246_v31, 7  ;;  %v1002_v31 = vpack.c.bf16 %v628_v29, %v626_v28  ;;  %v663_v28 = vld [vmem:[#allocation10 + $0x1f0] sm:$0xff] }
 0x153   :  { %919 = vmatpush1.bf16.msra.mxu0 %v918_v36 }
 0x154   :  { %921 = vmatprep.subr.bf16.mxu0 %v920_v37  ;;  %v264_v33 = vsub.s32 4, %v1339_v32  ;;  %v252_v35 = vsub.s32 1, %v1339_v32  ;;  %v248_v44 = vsub.s32 0, %v1339_v32  ;;  %v260_v45 = vsub.s32 3, %v1339_v32 }
 0x156   :  { %v265_v36 = vrot.slane %v1345_v34, %v264_v33  ;;  %v253_v37 = vrot.slane %v1345_v34, %v252_v35  ;;  %v249_v46 = vrot.slane %v1345_v34, %v248_v44  ;;  %v625_v33 = vld [vmem:[#allocation10 + $0xc0] sm:$0xff]  ;;  %v627_v35 = vld [vmem:[#allocation10 + $0xd0] sm:$0xff] }
 0x157   :  { %923 = vmatpush1.bf16.msra.mxu0 %v922_v41 }
 0x158   :  { %925 = vmatprep.subr.bf16.mxu0 %v924_v42 }
 0x15b   :  { %927 = vmatpush1.bf16.msra.mxu0 %v926_v47  ;;  %v261_v47 = vrot.slane %v1345_v34, %v260_v45  ;;  %v633_v45 = vld [vmem:[#allocation10 + $0x100] sm:$0xff] }
 0x15c   :  { %947 = vmatprep.subr.bf16.mxu0 %v946_v48 }
 0x15e   :  { %763 = vmatmul.mubr.msk.f32.vlgmr.msra.gmra.mrb[4].mxu0 %vm271_vm2, %v183_v18  ;;  %v517_v18 = vld [vmem:[#allocation8 + $0xe0] sm:$0xff] }
 0x15f   :  { %949 = vmatpush3.bf16.msra.mxu0 %v948_v51  ;;  %v970_v21 = vpack.c.bf16 %v518_v19, %v517_v18  ;;  %v994_v19 = vpack.c.bf16 %v620_v17, %v618_v16  ;;  %v658_v16 = vld [vmem:[#allocation10 + $0x1c8] sm:$0xff] }
 0x160   :  { %951 = vmatprep.subr.bf16.mxu0 %v950_v54  ;;  %v604_v54 = vld [vmem:[#allocation10 + $0x18] sm:$0xff] }
 0x161   :  { %v978_v56 = vpack.c.bf16 %v604_v54, %v602_v53  ;;  %v639_v53 = vld [vmem:[#allocation10 + $0x130] sm:$0xff]  ;;  %v642_v54 = vld [vmem:[#allocation10 + $0x148] sm:$0xff] }
 0x163   :  { %953 = vmatpush3.bf16.msra.mxu0 %v952_v57  ;;  %v603_v57 = vld [vmem:[#allocation10 + $0x10] sm:$0xff]  ;;  %979 = vmatprep.subr.bf16.mxu1 %v978_v56 }
 0x164   :  { %955 = vmatprep.subr.bf16.mxu0 %v954_v60  ;;  %v980_v60 = vpack.c.bf16 %v603_v57, %v601_v55  ;;  %v644_v55 = vld [vmem:[#allocation10 + $0x158] sm:$0xff] }
 0x165   :  { %v1018_v57 = vpack.c.bf16 %v644_v55, %v642_v54 }
 0x166   :  { %981 = vmatpush1.bf16.msra.mxu1 %v980_v60  ;;  %v1020_v60 = vpack.c.bf16 %v643_v59, %v641_v58 }
 0x167   :  { %957 = vmatpush3.bf16.msra.mxu0 %v956_v63  ;;  %v607_v63 = vld [vmem:[#allocation10 + $0x30] sm:$0xff]  ;;  %983 = vmatprep.subr.bf16.mxu1 %v982_v61  ;;  %v646_v61 = vld [vmem:[#allocation10 + $0x168] sm:$0xff] }
 0x168   :  { %959 = vmatprep.subr.bf16.mxu0 %v958_v0  ;;  %v984_v4 = vpack.c.bf16 %v607_v63, %v605_v62  ;;  %v986_v0 = vpack.c.bf16 %v612_v3, %v610_v2  ;;  %v648_v62 = vld [vmem:[#allocation10 + $0x178] sm:$0xff]  ;;  %v645_v2 = vld [vmem:[#allocation10 + $0x160] sm:$0xff]  ;;  %v647_v3 = vld [vmem:[#allocation10 + $0x170] sm:$0xff] }
 0x169   :  { %v1022_v63 = vpack.c.bf16 %v648_v62, %v646_v61 }
 0x16a   :  { %985 = vmatpush1.bf16.msra.mxu1 %v984_v4  ;;  %v1024_v4 = vpack.c.bf16 %v647_v3, %v645_v2 }
 0x16b   :  { %961 = vmatpush3.bf16.msra.mxu0 %v960_v8  ;;  %v616_v8 = vld [vmem:[#allocation10 + $0x78] sm:$0xff]  ;;  %987 = vmatprep.subr.bf16.mxu1 %v986_v0  ;;  %v650_v0 = vld [vmem:[#allocation10 + $0x188] sm:$0xff] }
 0x16c   :  { %963 = vmatprep.subr.bf16.mxu0 %v962_v9  ;;  %v990_v13 = vpack.c.bf16 %v616_v8, %v614_v7  ;;  %v1026_v6 = vpack.c.bf16 %v652_v5, %v650_v0  ;;  %v649_v7 = vld [vmem:[#allocation10 + $0x180] sm:$0xff]  ;;  %v651_v8 = vld [vmem:[#allocation10 + $0x190] sm:$0xff] }
 0x16e   :  { %989 = vmatpush1.bf16.msra.mxu1 %v988_v11  ;;  %v656_v11 = vld [vmem:[#allocation10 + $0x1b8] sm:$0xff] }
 0x16f   :  { %965 = vmatpush3.bf16.msra.mxu0 %v964_v14  ;;  %v613_v14 = vld [vmem:[#allocation10 + $0x60] sm:$0xff]  ;;  %991 = vmatprep.subr.bf16.mxu1 %v990_v13 }
 0x170   :  { %967 = vmatprep.subr.bf16.mxu0 %v966_v15  ;;  %v615_v15 = vld [vmem:[#allocation10 + $0x70] sm:$0xff] }
 0x171   :  { %v992_v18 = vpack.c.bf16 %v615_v15, %v613_v14  ;;  %v653_v14 = vld [vmem:[#allocation10 + $0x1a0] sm:$0xff]  ;;  %v655_v15 = vld [vmem:[#allocation10 + $0x1b0] sm:$0xff] }
 0x172   :  { %v1032_v17 = vpack.c.bf16 %v655_v15, %v653_v14 }
 0x173   :  { %969 = vmatpush3.bf16.msra.mxu0 %v968_v20  ;;  %v617_v20 = vld [vmem:[#allocation10 + $0x80] sm:$0xff]  ;;  %993 = vmatpush1.bf16.msra.mxu1 %v992_v18  ;;  %v660_v18 = vld [vmem:[#allocation10 + $0x1d8] sm:$0xff] }
 0x174   :  { %971 = vmatprep.subr.bf16.mxu0 %v970_v21  ;;  %v619_v21 = vld [vmem:[#allocation10 + $0x90] sm:$0xff]  ;;  %995 = vmatprep.subr.bf16.mxu1 %v994_v19  ;;  %v657_v19 = vld [vmem:[#allocation10 + $0x1c0] sm:$0xff] }
 0x177   :  { %973 = vmatpush3.bf16.msra.mxu0 %v972_v24  ;;  %v996_v24 = vpack.c.bf16 %v619_v21, %v617_v20  ;;  %v659_v20 = vld [vmem:[#allocation10 + $0x1d0] sm:$0xff]  ;;  %v1034_v21 = vpack.c.bf16 %v660_v18, %v658_v16 }
 0x178   :  { %975 = vmatprep.subr.bf16.mxu0 %v974_v27  ;;  %v623_v27 = vld [vmem:[#allocation10 + $0xb0] sm:$0xff] }
 0x179   :  { %997 = vmatpush1.bf16.msra.mxu1 %v996_v24  ;;  %v1036_v24 = vpack.c.bf16 %v659_v20, %v657_v19 }
 0x17a   :  { %999 = vmatprep.subr.bf16.mxu1 %v998_v25 }
 0x17b   :  { %977 = vmatpush3.bf16.msra.mxu0 %v976_v30  ;;  %v1000_v30 = vpack.c.bf16 %v623_v27, %v621_v26  ;;  %v1038_v26 = vpack.c.bf16 %v664_v23, %v662_v22  ;;  %v661_v27 = vld [vmem:[#allocation10 + $0x1e0] sm:$0xff] }
 0x17d   :  { %1001 = vmatpush1.bf16.msra.mxu1 %v1000_v30  ;;  %v1040_v30 = vpack.c.bf16 %v663_v28, %v661_v27 }
 0x17e   :  { %1003 = vmatprep.subr.bf16.mxu1 %v1002_v31 }
 0x219   :  { %v341_v38 = vpop.f32.mrb[2].mxu0  ;;  %v483_v1 = vpop.f32.mrb[0].mxu1 }
 0x21a   :  { %v484_v39 = vadd.f32 %v483_v1, %v265_v36  ;;  %v343_v40 = vpop.f32.mrb[3].mxu0  ;;  %v867_v41 = vpop.f32.mrb[1].mxu1  ;;  %v342_v50 = vadd.f32 %v341_v38, %v249_v46  ;;  %v630_v36 = vld [vmem:[#allocation10 + $0xe8] sm:$0xff]  ;;  %v1004_v38 = vpack.c.bf16 %v627_v35, %v625_v33  ;;  %v635_v46 = vld [vmem:[#allocation10 + $0x110] sm:$0xff] }
 0x21b   :  { %v344_v42 = vadd.f32 %v343_v40, %v253_v37  ;;  %v632_v37 = vld [vmem:[#allocation10 + $0xf8] sm:$0xff]  ;;  %v631_v40 = vld [vmem:[#allocation10 + $0xf0] sm:$0xff]  ;;  %v634_v41 = vld [vmem:[#allocation10 + $0x108] sm:$0xff] }
 0x21c   :  { %v1006_v1 = vpack.c.bf16 %v632_v37, %v630_v36  ;;  %1005 = vmatpush1.bf16.msra.mxu1 %v1004_v38  ;;  %v256_v37 = vsub.s32 2, %v1339_v32 }
 0x21d   :  { %v488_v43 = vmul.f32 %v484_v39, %v344_v42  ;;  %v629_v39 = vld [vmem:[#allocation10 + $0xe0] sm:$0xff]  ;;  %v636_v42 = vld [vmem:[#allocation10 + $0x118] sm:$0xff] }
 0x21e   :  { %1007 = vmatprep.subr.bf16.mxu1 %v1006_v1  ;;  %v1010_v44 = vpack.c.bf16 %v636_v42, %v634_v41  ;;  %v257_v38 = vrot.slane %v1345_v34, %v256_v37 }
 0x21f   :  { %585 = vmatprep.mubr.f32.mxu0 %v488_v43  ;;  %v1008_v43 = vpack.c.bf16 %v631_v40, %v629_v39 }
 0x221   :  { %1009 = vmatpush1.bf16.msra.mxu1 %v1008_v43 }
 0x222   :  { %1011 = vmatprep.subr.bf16.mxu1 %v1010_v44 }
 0x231   :  { %v1354_v48 = vpop.f32.mrb[4].mxu0 }
 0x232   :  { %v414_v49 = vpop.f32.mrb[5].mxu0  ;;  %v413_v1 = vadd.f32 %v1354_v48, %v257_v38 }
 0x233   :  { %v415_v51 = vadd.f32 %v414_v49, %v261_v47  ;;  %v638_v47 = vld [vmem:[#allocation10 + $0x128] sm:$0xff]  ;;  %v640_v49 = vld [vmem:[#allocation10 + $0x138] sm:$0xff] }
 0x235   :  { %v487_v52 = vmul.f32 %v415_v51, %v342_v50  ;;  %v1012_v50 = vpack.c.bf16 %v635_v46, %v633_v45  ;;  %v1014_v51 = vpack.c.bf16 %v640_v49, %v638_v47 }
 0x237   :  { %586 = vmatmul.mubr.f32.vlgmr.msra.gmra.mrb[6].mxu0 %v487_v52  ;;  %v637_v52 = vld [vmem:[#allocation10 + $0x120] sm:$0xff]  ;;  %1013 = vmatpush1.bf16.msra.mxu1 %v1012_v50 }
 0x238   :  { %v1016_v56 = vpack.c.bf16 %v639_v53, %v637_v52  ;;  %1015 = vmatprep.subr.bf16.mxu1 %v1014_v51 }
 0x23b   :  { %1017 = vmatpush1.bf16.msra.mxu1 %v1016_v56 }
 0x23c   :  { %1019 = vmatprep.subr.bf16.mxu1 %v1018_v57 }
 0x23f   :  { %1021 = vmatpush1.bf16.msra.mxu1 %v1020_v60 }
 0x240   :  { %1023 = vmatprep.subr.bf16.mxu1 %v1022_v63 }
 0x243   :  { %1025 = vmatpush1.bf16.msra.mxu1 %v1024_v4 }
 0x244   :  { %1027 = vmatprep.subr.bf16.mxu1 %v1026_v6 }
 0x30a   :  { %v819_v9 = vpop.f32.mrb[6].mxu0 }
 0x30b   :  { %v820_v10 = vpop.f32.mrb[7].mxu0 }
 0x30c   :  { %v1356_v12 = vadd.f32 %v820_v10, %v819_v9  ;;  %v1028_v9 = vpack.c.bf16 %v651_v8, %v649_v7  ;;  %v654_v10 = vld [vmem:[#allocation10 + $0x1a8] sm:$0xff] }
 0x30d   :  { %v1030_v13 = vpack.c.bf16 %v656_v11, %v654_v10 }
 0x30e   :  { %591 = vrot.lane.b32.xlu0 %v1356_v12, %s1212_s5  ;;  %1029 = vmatpush1.bf16.msra.mxu1 %v1028_v9 }
 0x30f   :  { %1031 = vmatprep.subr.bf16.mxu1 %v1030_v13 }
 0x312   :  { %1033 = vmatpush1.bf16.msra.mxu1 %v1032_v17 }
 0x313   :  { %1035 = vmatprep.subr.bf16.mxu1 %v1034_v21 }
 0x316   :  { %1037 = vmatpush1.bf16.msra.mxu1 %v1036_v24 }
 0x317   :  { %1039 = vmatprep.subr.bf16.mxu1 %v1038_v26 }
 0x31a   :  { %1041 = vmatpush1.bf16.msra.mxu1 %v1040_v30 }
 0x380   :  { %v592_v25 = vpop.permute.xlu0 %591 }
 0x381   :  { %v593_v29 = vmax.f32 %v1356_v12, %v592_v25 }
 0x383   :  { %594 = vrot.lane.b32.xlu0 %v593_v29, %s1216_s4 }
 0x3f5   :  { %v595_v31 = vpop.permute.xlu0 %594 }
 0x3f6   :  { %v596_v33 = vmax.f32 %v593_v29, %v595_v31 }
 0x3f8   :  { %v597_v35 = vsub.f32 %v1356_v12, %v596_v33 }
 0x3fa   :  { %v598_v36 = vmul.f32 1.442695, %v597_v35 }
 0x3fc   :  { %1058 = vpow2.f32 %v598_v36 }
 0x406   :  { %v1059_v39 = vpop.eup %1058 }
 0x407   :  { %v600_v40 = vmul.f32 %v1059_v39, %v413_v1 }
 0x409   :  { %729 = vmatprep.mubr.f32.mxu1 %v600_v40 }
 0x40a   :  { %730 = vmatmul.mubr.f32.vlgmr.msra.gmra.mrb[2].mxu1 %v1059_v39 }
 0x4dd   :  { %v731_v41 = vpop.f32.mrb[2].mxu1 }
 0x4de   :  { %v736_v42 = vadd.f32 1e-30, %v731_v41  ;;  %v733_v43 = vpop.f32.mrb[3].mxu1 }
 0x4e0   :  { %1060 = vrcp.f32 %v736_v42 }
 0x4ea   :  { %v1061_v44 = vpop.eup %1060 }
 0x4eb   :  { %v738_v45 = vmul.f32 %v1061_v44, %v736_v42 }
 0x4ed   :  { %v739_v46 = vsub.f32 2.0, %v738_v45 }
 0x4ef   :  { %v740_v12 = vmul.f32 %v1061_v44, %v739_v46 }
 0x4f1   :  { %v741_v47 = vmul.f32 %v740_v12, %v733_v43 }
 0x4f3   :  { %742 = vst [vmem:[#allocation11] sm:$0x3] %v741_v47 }
 0x4f4   :  { %1183 = shalt.err (!%p1180_p2)
}
 0x4f5   :  { %s1184_s23 = scalar_lea.hbm %s1384_s7, 32 }
 0x4f6   :  { %p1185_p3 = scmp.ne.s32.totalorder %s1384_s7, %s1184_s23  ;;  %p1188_p4 = scmp.lt.u32.totalorder %s1184_s23, %s1384_s7 }
 0x4f8   :  { %p1190_p5 = pnand %p1188_p4, %p1185_p3 }
 0x4fa   :  { %1193 = shalt.err (!%p1190_p5)
}
 0x4fb   :  { %752 = dma.vmem_to_hbm [thread:$0]  %s750_s19, 32, %s1384_s7, [#allocation4]  }
 0x4fc   :  { %1200 = dma.done.wait [#allocation4], 32  }
 0x4fd   :  { %1201 = vsyncadd [#allocation4], 4294967264 }
 0x4fe   :  { %756 = vsyncpa [#allocation3], 1 }
 0x4ff   :  { %757 = vsyncpa [#allocation6], 1 }
 0x500   :  { %758 = vsyncpa [#allocation9], 1 }
 0x501   :  { %759 = vsyncpa [#allocation4], 1 }

</bundles_post_ra>
